<compile_context>
chip_gen: v7x
topology: tpu7x:2x2x1
jax: 0.10.0
libtpu: 0.0.40
codegen_flags: <defaults>
</compile_context>

<pallas_src>
import functools

import jax
import jax.numpy as jnp
from jax.experimental import pallas as pl
from jax.experimental.pallas import tpu as pltpu


def _pick_seq_tile(seq_len, max_tile=256):
    """Largest power-of-two tile (>=8, <=max_tile) dividing seq_len."""
    t = max_tile
    while t >= 8:
        if seq_len % t == 0:
            return t
        t //= 2
    return seq_len


def bert_embeddings_kernel(
    word_ids_ref,    # SMEM scalar-prefetch: (B, S) int32 token ids
    word_hbm_ref,    # HBM (memory_space=pl.ANY): word-embedding table (V, H)
    pos_ref,         # VMEM (TILE_S, H): contiguous slice of the position table
    gamma_ref,       # VMEM (1, H): LayerNorm weight (float32)
    beta_ref,        # VMEM (1, H): LayerNorm bias   (float32)
    out_ref,         # VMEM (TILE_S, H): output tile
    word_stage_ref,  # VMEM scratch (TILE_S, H): gathered word-embedding rows
    gather_sems,     # DMA semaphores (NUM_SEMS,)
    *, eps, tile_s, num_sems,
):
    b = pl.program_id(0)
    s = pl.program_id(1)
    base = s * tile_s
    unroll = tile_s <= 64

    # ---- word-row gather: fan out one small DMA per token, all in flight ----
    def _start(i, carry):
        row = word_ids_ref[b, base + i]
        pltpu.make_async_copy(
            word_hbm_ref.at[pl.ds(row, 1)],
            word_stage_ref.at[pl.ds(i, 1)],
            gather_sems.at[i % num_sems],
        ).start()
        return carry

    jax.lax.fori_loop(0, tile_s, _start, 0, unroll=unroll)

    # Wait for every gather before consuming the staged tile (only the copy
    # size / semaphore matter for the wait descriptor).
    def _wait(i, carry):
        pltpu.make_async_copy(
            word_hbm_ref.at[pl.ds(0, 1)],
            word_stage_ref.at[pl.ds(i, 1)],
            gather_sems.at[i % num_sems],
        ).wait()
        return carry

    jax.lax.fori_loop(0, tile_s, _wait, 0, unroll=unroll)

    # ---- word + position add, then LayerNorm over the hidden dim ----
    x = word_stage_ref[...].astype(jnp.float32) + pos_ref[...].astype(jnp.float32)
    inv_h = jnp.float32(1.0 / x.shape[-1])
    total = jnp.sum(x, axis=-1, keepdims=True)
    total_sq = jnp.sum(x * x, axis=-1, keepdims=True)
    mean = total * inv_h
    var = total_sq * inv_h - mean * mean
    y = (x - mean) * jax.lax.rsqrt(var + eps)
    y = y * gamma_ref[...] + beta_ref[...]
    # TODO(synk): dropout is eval-mode identity; training-mode dropout would use
    # pltpu.prng_seed / pltpu.prng_random_bits per tile.
    out_ref[...] = y.astype(out_ref.dtype)


def bert_embeddings(input_ids, word_emb, pos_emb, gamma, beta, *, eps=1e-12):
    B, S = input_ids.shape
    V, H = word_emb.shape
    P, _ = pos_emb.shape
    assert S <= P, "sequence length exceeds max_position_embeddings"
    assert H % 128 == 0, "hidden size must be a multiple of 128 (lane-dense tiles)"

    tile_s = _pick_seq_tile(S)
    n_s = S // tile_s
    num_sems = max(1, min(tile_s, 8))

    word_ids = input_ids.astype(jnp.int32)
    gamma2 = gamma.reshape(1, H).astype(jnp.float32)
    beta2 = beta.reshape(1, H).astype(jnp.float32)

    grid_spec = pltpu.PrefetchScalarGridSpec(
        num_scalar_prefetch=1,
        grid=(B, n_s),
        in_specs=[
            # word table: stays in HBM, rows gathered by manual DMA in-kernel
            # (BERT vocab table is far too large to cache in VMEM).
            pl.BlockSpec(memory_space=pl.ANY),
            # positions within a seq tile are contiguous -> plain tiled block.
            pl.BlockSpec((tile_s, H), lambda b, s, wid: (s, 0)),
            # gamma / beta: same (full-array) block every step -> VMEM-resident.
            pl.BlockSpec((1, H), lambda b, s, wid: (0, 0)),
            pl.BlockSpec((1, H), lambda b, s, wid: (0, 0)),
        ],
        out_specs=pl.BlockSpec((tile_s, H), lambda b, s, wid: (b * n_s + s, 0)),
        scratch_shapes=[
            pltpu.VMEM((tile_s, H), word_emb.dtype),
            pltpu.SemaphoreType.DMA((num_sems,)),
        ],
    )

    out = pl.pallas_call(
        functools.partial(
            bert_embeddings_kernel, eps=eps, tile_s=tile_s, num_sems=num_sems),
        out_shape=jax.ShapeDtypeStruct((B * S, H), word_emb.dtype),
        grid_spec=grid_spec,
        compiler_params=pltpu.CompilerParams(
            dimension_semantics=("parallel", "parallel")),
    )(word_ids, word_emb, pos_emb, gamma2, beta2)
    return out.reshape(B, S, H)


def bert_embeddings_ref(input_ids, word_emb, pos_emb, gamma, beta, eps=1e-12):
    B, S = input_ids.shape
    w = word_emb[input_ids]                                  # (B, S, H)
    p = pos_emb[jnp.arange(S)][None, :, :]                   # (1, S, H)
    x = (w + p).astype(jnp.float32)
    mean = x.mean(-1, keepdims=True)
    var = ((x - mean) ** 2).mean(-1, keepdims=True)
    y = (x - mean) * jax.lax.rsqrt(var + eps)
    return y * gamma + beta


if __name__ == "__main__":
    # Small, deterministic shapes consistent with the module.
    B, S, H = 2, 8, 128
    VOCAB, MAX_POS = 64, 16
    EPS = 1e-12

    key = jax.random.PRNGKey(0)
    k_ids, k_word, k_pos, k_g, k_b = jax.random.split(key, 5)

    input_ids = jax.random.randint(k_ids, (B, S), 0, VOCAB, dtype=jnp.int32)

    word_emb = 0.02 * jax.random.normal(k_word, (VOCAB, H), dtype=jnp.float32)
    word_emb = word_emb.at[0].set(0.0)  # nn.Embedding padding_idx=0
    pos_emb = 0.02 * jax.random.normal(k_pos, (MAX_POS, H), dtype=jnp.float32)
    gamma = 1.0 + 0.1 * jax.random.normal(k_g, (H,), dtype=jnp.float32)
    beta = 0.1 * jax.random.normal(k_b, (H,), dtype=jnp.float32)

    out = bert_embeddings(input_ids, word_emb, pos_emb, gamma, beta, eps=EPS)
    out = jax.block_until_ready(out)

    ref = bert_embeddings_ref(input_ids, word_emb, pos_emb, gamma, beta, eps=EPS)
    assert out.shape == (B, S, H)
    assert jnp.allclose(out, ref, atol=1e-4, rtol=1e-4), "mismatch vs reference"

    print("KERNEL_OK")
</pallas_src>

<mosaic_0001>
module attributes {stable_mosaic.version = 11 : i64} {
  func.func @bert_embeddings_kernel(%arg0: i32, %arg1: i32, %arg2: memref<2x8xi32, #tpu.memory_space<smem>>, %arg3: memref<64x128xf32, #tpu.memory_space<any>>, %arg4: memref<8x128xf32, #tpu.memory_space<vmem>>, %arg5: memref<1x128xf32, #tpu.memory_space<vmem>>, %arg6: memref<1x128xf32, #tpu.memory_space<vmem>>, %arg7: memref<8x128xf32, #tpu.memory_space<vmem>>, %arg8: memref<8x128xf32, #tpu.memory_space<vmem>>, %arg9: memref<8x!tpu.dma_semaphore, #tpu.memory_space<semaphore_mem>>) attributes {dimension_semantics = [#tpu.dimension_semantics<parallel>, #tpu.dimension_semantics<parallel>], iteration_bounds = array<i64: 2, 1>, scalar_prefetch = 1 : i64, scratch_operands = 2 : i64, tpu.core_type = #tpu.core_type<tc>, window_params = [{}, {transform_indices = @transform_1, window_bounds = array<i64: 8, 128>}, {pipeline_mode = #tpu.pipeline_mode<synchronous>, transform_indices = @transform_2, window_bounds = array<i64: 1, 128>}, {pipeline_mode = #tpu.pipeline_mode<synchronous>, transform_indices = @transform_3, window_bounds = array<i64: 1, 128>}, {transform_indices = @transform_4, window_bounds = array<i64: 8, 128>}]} {
    %c8_i32 = arith.constant 8 : i32
    %0 = arith.muli %arg1, %c8_i32 : i32
    %c0_i32 = arith.constant 0 : i32
    %1 = arith.addi %0, %c0_i32 : i32
    %2 = arith.index_cast %arg0 : i32 to index
    %3 = arith.index_cast %1 : i32 to index
    %4 = memref.load %arg2[%2, %3] : memref<2x8xi32, #tpu.memory_space<smem>>
    %c8_i32_0 = arith.constant 8 : i32
    %c0_i32_1 = arith.constant 0 : i32
    %5 = arith.cmpi eq, %c8_i32_0, %c0_i32_1 : i32
    %c1_i32 = arith.constant 1 : i32
    %6 = arith.select %5, %c1_i32, %c8_i32_0 : i32
    %7 = arith.remsi %c0_i32, %6 : i32
    %c0_i32_2 = arith.constant 0 : i32
    %8 = arith.cmpi ne, %7, %c0_i32_2 : i32
    %c0_i32_3 = arith.constant 0 : i32
    %9 = arith.cmpi slt, %7, %c0_i32_3 : i32
    %c0_i32_4 = arith.constant 0 : i32
    %10 = arith.cmpi slt, %6, %c0_i32_4 : i32
    %11 = arith.xori %9, %10 : i1
    %12 = arith.andi %11, %8 : i1
    %13 = arith.addi %7, %6 : i32
    %14 = arith.select %12, %13, %7 : i32
    %c0_i32_5 = arith.constant 0 : i32
    %15 = tpu.memref_slice %arg3[%4, %c0_i32_5] : memref<64x128xf32, #tpu.memory_space<any>> -> memref<1x128xf32, #tpu.memory_space<any>>
    %c0_i32_6 = arith.constant 0 : i32
    %16 = tpu.memref_slice %arg8[%c0_i32, %c0_i32_6] : memref<8x128xf32, #tpu.memory_space<vmem>> -> memref<1x128xf32, #tpu.memory_space<vmem>>
    %17 = tpu.memref_slice %arg9[%14] : memref<8x!tpu.dma_semaphore, #tpu.memory_space<semaphore_mem>> -> memref<1x!tpu.dma_semaphore, #tpu.memory_space<semaphore_mem>>
    %18 = tpu.memref_squeeze %17 : memref<1x!tpu.dma_semaphore, #tpu.memory_space<semaphore_mem>> -> memref<!tpu.dma_semaphore, #tpu.memory_space<semaphore_mem>>
    tpu.enqueue_dma source(%15 : memref<1x128xf32, #tpu.memory_space<any>>) target(%16 : memref<1x128xf32, #tpu.memory_space<vmem>>) target_semaphore(%18 : memref<!tpu.dma_semaphore, #tpu.memory_space<semaphore_mem>>)
    %c1_i32_7 = arith.constant 1 : i32
    %19 = arith.addi %0, %c1_i32_7 : i32
    %20 = arith.index_cast %arg0 : i32 to index
    %21 = arith.index_cast %19 : i32 to index
    %22 = memref.load %arg2[%20, %21] : memref<2x8xi32, #tpu.memory_space<smem>>
    %c8_i32_8 = arith.constant 8 : i32
    %c0_i32_9 = arith.constant 0 : i32
    %23 = arith.cmpi eq, %c8_i32_8, %c0_i32_9 : i32
    %c1_i32_10 = arith.constant 1 : i32
    %24 = arith.select %23, %c1_i32_10, %c8_i32_8 : i32
    %25 = arith.remsi %c1_i32_7, %24 : i32
    %c0_i32_11 = arith.constant 0 : i32
    %26 = arith.cmpi ne, %25, %c0_i32_11 : i32
    %c0_i32_12 = arith.constant 0 : i32
    %27 = arith.cmpi slt, %25, %c0_i32_12 : i32
    %c0_i32_13 = arith.constant 0 : i32
    %28 = arith.cmpi slt, %24, %c0_i32_13 : i32
    %29 = arith.xori %27, %28 : i1
    %30 = arith.andi %29, %26 : i1
    %31 = arith.addi %25, %24 : i32
    %32 = arith.select %30, %31, %25 : i32
    %c0_i32_14 = arith.constant 0 : i32
    %33 = tpu.memref_slice %arg3[%22, %c0_i32_14] : memref<64x128xf32, #tpu.memory_space<any>> -> memref<1x128xf32, #tpu.memory_space<any>>
    %c0_i32_15 = arith.constant 0 : i32
    %34 = tpu.memref_slice %arg8[%c1_i32_7, %c0_i32_15] : memref<8x128xf32, #tpu.memory_space<vmem>> -> memref<1x128xf32, #tpu.memory_space<vmem>>
    %35 = tpu.memref_slice %arg9[%32] : memref<8x!tpu.dma_semaphore, #tpu.memory_space<semaphore_mem>> -> memref<1x!tpu.dma_semaphore, #tpu.memory_space<semaphore_mem>>
    %36 = tpu.memref_squeeze %35 : memref<1x!tpu.dma_semaphore, #tpu.memory_space<semaphore_mem>> -> memref<!tpu.dma_semaphore, #tpu.memory_space<semaphore_mem>>
    tpu.enqueue_dma source(%33 : memref<1x128xf32, #tpu.memory_space<any>>) target(%34 : memref<1x128xf32, #tpu.memory_space<vmem>>) target_semaphore(%36 : memref<!tpu.dma_semaphore, #tpu.memory_space<semaphore_mem>>)
    %c2_i32 = arith.constant 2 : i32
    %37 = arith.addi %0, %c2_i32 : i32
    %38 = arith.index_cast %arg0 : i32 to index
    %39 = arith.index_cast %37 : i32 to index
    %40 = memref.load %arg2[%38, %39] : memref<2x8xi32, #tpu.memory_space<smem>>
    %c8_i32_16 = arith.constant 8 : i32
    %c0_i32_17 = arith.constant 0 : i32
    %41 = arith.cmpi eq, %c8_i32_16, %c0_i32_17 : i32
    %c1_i32_18 = arith.constant 1 : i32
    %42 = arith.select %41, %c1_i32_18, %c8_i32_16 : i32
    %43 = arith.remsi %c2_i32, %42 : i32
    %c0_i32_19 = arith.constant 0 : i32
    %44 = arith.cmpi ne, %43, %c0_i32_19 : i32
    %c0_i32_20 = arith.constant 0 : i32
    %45 = arith.cmpi slt, %43, %c0_i32_20 : i32
    %c0_i32_21 = arith.constant 0 : i32
    %46 = arith.cmpi slt, %42, %c0_i32_21 : i32
    %47 = arith.xori %45, %46 : i1
    %48 = arith.andi %47, %44 : i1
    %49 = arith.addi %43, %42 : i32
    %50 = arith.select %48, %49, %43 : i32
    %c0_i32_22 = arith.constant 0 : i32
    %51 = tpu.memref_slice %arg3[%40, %c0_i32_22] : memref<64x128xf32, #tpu.memory_space<any>> -> memref<1x128xf32, #tpu.memory_space<any>>
    %c0_i32_23 = arith.constant 0 : i32
    %52 = tpu.memref_slice %arg8[%c2_i32, %c0_i32_23] : memref<8x128xf32, #tpu.memory_space<vmem>> -> memref<1x128xf32, #tpu.memory_space<vmem>>
    %53 = tpu.memref_slice %arg9[%50] : memref<8x!tpu.dma_semaphore, #tpu.memory_space<semaphore_mem>> -> memref<1x!tpu.dma_semaphore, #tpu.memory_space<semaphore_mem>>
    %54 = tpu.memref_squeeze %53 : memref<1x!tpu.dma_semaphore, #tpu.memory_space<semaphore_mem>> -> memref<!tpu.dma_semaphore, #tpu.memory_space<semaphore_mem>>
    tpu.enqueue_dma source(%51 : memref<1x128xf32, #tpu.memory_space<any>>) target(%52 : memref<1x128xf32, #tpu.memory_space<vmem>>) target_semaphore(%54 : memref<!tpu.dma_semaphore, #tpu.memory_space<semaphore_mem>>)
    %c3_i32 = arith.constant 3 : i32
    %55 = arith.addi %0, %c3_i32 : i32
    %56 = arith.index_cast %arg0 : i32 to index
    %57 = arith.index_cast %55 : i32 to index
    %58 = memref.load %arg2[%56, %57] : memref<2x8xi32, #tpu.memory_space<smem>>
    %c8_i32_24 = arith.constant 8 : i32
    %c0_i32_25 = arith.constant 0 : i32
    %59 = arith.cmpi eq, %c8_i32_24, %c0_i32_25 : i32
    %c1_i32_26 = arith.constant 1 : i32
    %60 = arith.select %59, %c1_i32_26, %c8_i32_24 : i32
    %61 = arith.remsi %c3_i32, %60 : i32
    %c0_i32_27 = arith.constant 0 : i32
    %62 = arith.cmpi ne, %61, %c0_i32_27 : i32
    %c0_i32_28 = arith.constant 0 : i32
    %63 = arith.cmpi slt, %61, %c0_i32_28 : i32
    %c0_i32_29 = arith.constant 0 : i32
    %64 = arith.cmpi slt, %60, %c0_i32_29 : i32
    %65 = arith.xori %63, %64 : i1
    %66 = arith.andi %65, %62 : i1
    %67 = arith.addi %61, %60 : i32
    %68 = arith.select %66, %67, %61 : i32
    %c0_i32_30 = arith.constant 0 : i32
    %69 = tpu.memref_slice %arg3[%58, %c0_i32_30] : memref<64x128xf32, #tpu.memory_space<any>> -> memref<1x128xf32, #tpu.memory_space<any>>
    %c0_i32_31 = arith.constant 0 : i32
    %70 = tpu.memref_slice %arg8[%c3_i32, %c0_i32_31] : memref<8x128xf32, #tpu.memory_space<vmem>> -> memref<1x128xf32, #tpu.memory_space<vmem>>
    %71 = tpu.memref_slice %arg9[%68] : memref<8x!tpu.dma_semaphore, #tpu.memory_space<semaphore_mem>> -> memref<1x!tpu.dma_semaphore, #tpu.memory_space<semaphore_mem>>
    %72 = tpu.memref_squeeze %71 : memref<1x!tpu.dma_semaphore, #tpu.memory_space<semaphore_mem>> -> memref<!tpu.dma_semaphore, #tpu.memory_space<semaphore_mem>>
    tpu.enqueue_dma source(%69 : memref<1x128xf32, #tpu.memory_space<any>>) target(%70 : memref<1x128xf32, #tpu.memory_space<vmem>>) target_semaphore(%72 : memref<!tpu.dma_semaphore, #tpu.memory_space<semaphore_mem>>)
    %c4_i32 = arith.constant 4 : i32
    %73 = arith.addi %0, %c4_i32 : i32
    %74 = arith.index_cast %arg0 : i32 to index
    %75 = arith.index_cast %73 : i32 to index
    %76 = memref.load %arg2[%74, %75] : memref<2x8xi32, #tpu.memory_space<smem>>
    %c8_i32_32 = arith.constant 8 : i32
    %c0_i32_33 = arith.constant 0 : i32
    %77 = arith.cmpi eq, %c8_i32_32, %c0_i32_33 : i32
    %c1_i32_34 = arith.constant 1 : i32
    %78 = arith.select %77, %c1_i32_34, %c8_i32_32 : i32
    %79 = arith.remsi %c4_i32, %78 : i32
    %c0_i32_35 = arith.constant 0 : i32
    %80 = arith.cmpi ne, %79, %c0_i32_35 : i32
    %c0_i32_36 = arith.constant 0 : i32
    %81 = arith.cmpi slt, %79, %c0_i32_36 : i32
    %c0_i32_37 = arith.constant 0 : i32
    %82 = arith.cmpi slt, %78, %c0_i32_37 : i32
    %83 = arith.xori %81, %82 : i1
    %84 = arith.andi %83, %80 : i1
    %85 = arith.addi %79, %78 : i32
    %86 = arith.select %84, %85, %79 : i32
    %c0_i32_38 = arith.constant 0 : i32
    %87 = tpu.memref_slice %arg3[%76, %c0_i32_38] : memref<64x128xf32, #tpu.memory_space<any>> -> memref<1x128xf32, #tpu.memory_space<any>>
    %c0_i32_39 = arith.constant 0 : i32
    %88 = tpu.memref_slice %arg8[%c4_i32, %c0_i32_39] : memref<8x128xf32, #tpu.memory_space<vmem>> -> memref<1x128xf32, #tpu.memory_space<vmem>>
    %89 = tpu.memref_slice %arg9[%86] : memref<8x!tpu.dma_semaphore, #tpu.memory_space<semaphore_mem>> -> memref<1x!tpu.dma_semaphore, #tpu.memory_space<semaphore_mem>>
    %90 = tpu.memref_squeeze %89 : memref<1x!tpu.dma_semaphore, #tpu.memory_space<semaphore_mem>> -> memref<!tpu.dma_semaphore, #tpu.memory_space<semaphore_mem>>
    tpu.enqueue_dma source(%87 : memref<1x128xf32, #tpu.memory_space<any>>) target(%88 : memref<1x128xf32, #tpu.memory_space<vmem>>) target_semaphore(%90 : memref<!tpu.dma_semaphore, #tpu.memory_space<semaphore_mem>>)
    %c5_i32 = arith.constant 5 : i32
    %91 = arith.addi %0, %c5_i32 : i32
    %92 = arith.index_cast %arg0 : i32 to index
    %93 = arith.index_cast %91 : i32 to index
    %94 = memref.load %arg2[%92, %93] : memref<2x8xi32, #tpu.memory_space<smem>>
    %c8_i32_40 = arith.constant 8 : i32
    %c0_i32_41 = arith.constant 0 : i32
    %95 = arith.cmpi eq, %c8_i32_40, %c0_i32_41 : i32
    %c1_i32_42 = arith.constant 1 : i32
    %96 = arith.select %95, %c1_i32_42, %c8_i32_40 : i32
    %97 = arith.remsi %c5_i32, %96 : i32
    %c0_i32_43 = arith.constant 0 : i32
    %98 = arith.cmpi ne, %97, %c0_i32_43 : i32
    %c0_i32_44 = arith.constant 0 : i32
    %99 = arith.cmpi slt, %97, %c0_i32_44 : i32
    %c0_i32_45 = arith.constant 0 : i32
    %100 = arith.cmpi slt, %96, %c0_i32_45 : i32
    %101 = arith.xori %99, %100 : i1
    %102 = arith.andi %101, %98 : i1
    %103 = arith.addi %97, %96 : i32
    %104 = arith.select %102, %103, %97 : i32
    %c0_i32_46 = arith.constant 0 : i32
    %105 = tpu.memref_slice %arg3[%94, %c0_i32_46] : memref<64x128xf32, #tpu.memory_space<any>> -> memref<1x128xf32, #tpu.memory_space<any>>
    %c0_i32_47 = arith.constant 0 : i32
    %106 = tpu.memref_slice %arg8[%c5_i32, %c0_i32_47] : memref<8x128xf32, #tpu.memory_space<vmem>> -> memref<1x128xf32, #tpu.memory_space<vmem>>
    %107 = tpu.memref_slice %arg9[%104] : memref<8x!tpu.dma_semaphore, #tpu.memory_space<semaphore_mem>> -> memref<1x!tpu.dma_semaphore, #tpu.memory_space<semaphore_mem>>
    %108 = tpu.memref_squeeze %107 : memref<1x!tpu.dma_semaphore, #tpu.memory_space<semaphore_mem>> -> memref<!tpu.dma_semaphore, #tpu.memory_space<semaphore_mem>>
    tpu.enqueue_dma source(%105 : memref<1x128xf32, #tpu.memory_space<any>>) target(%106 : memref<1x128xf32, #tpu.memory_space<vmem>>) target_semaphore(%108 : memref<!tpu.dma_semaphore, #tpu.memory_space<semaphore_mem>>)
    %c6_i32 = arith.constant 6 : i32
    %109 = arith.addi %0, %c6_i32 : i32
    %110 = arith.index_cast %arg0 : i32 to index
    %111 = arith.index_cast %109 : i32 to index
    %112 = memref.load %arg2[%110, %111] : memref<2x8xi32, #tpu.memory_space<smem>>
    %c8_i32_48 = arith.constant 8 : i32
    %c0_i32_49 = arith.constant 0 : i32
    %113 = arith.cmpi eq, %c8_i32_48, %c0_i32_49 : i32
    %c1_i32_50 = arith.constant 1 : i32
    %114 = arith.select %113, %c1_i32_50, %c8_i32_48 : i32
    %115 = arith.remsi %c6_i32, %114 : i32
    %c0_i32_51 = arith.constant 0 : i32
    %116 = arith.cmpi ne, %115, %c0_i32_51 : i32
    %c0_i32_52 = arith.constant 0 : i32
    %117 = arith.cmpi slt, %115, %c0_i32_52 : i32
    %c0_i32_53 = arith.constant 0 : i32
    %118 = arith.cmpi slt, %114, %c0_i32_53 : i32
    %119 = arith.xori %117, %118 : i1
    %120 = arith.andi %119, %116 : i1
    %121 = arith.addi %115, %114 : i32
    %122 = arith.select %120, %121, %115 : i32
    %c0_i32_54 = arith.constant 0 : i32
    %123 = tpu.memref_slice %arg3[%112, %c0_i32_54] : memref<64x128xf32, #tpu.memory_space<any>> -> memref<1x128xf32, #tpu.memory_space<any>>
    %c0_i32_55 = arith.constant 0 : i32
    %124 = tpu.memref_slice %arg8[%c6_i32, %c0_i32_55] : memref<8x128xf32, #tpu.memory_space<vmem>> -> memref<1x128xf32, #tpu.memory_space<vmem>>
    %125 = tpu.memref_slice %arg9[%122] : memref<8x!tpu.dma_semaphore, #tpu.memory_space<semaphore_mem>> -> memref<1x!tpu.dma_semaphore, #tpu.memory_space<semaphore_mem>>
    %126 = tpu.memref_squeeze %125 : memref<1x!tpu.dma_semaphore, #tpu.memory_space<semaphore_mem>> -> memref<!tpu.dma_semaphore, #tpu.memory_space<semaphore_mem>>
    tpu.enqueue_dma source(%123 : memref<1x128xf32, #tpu.memory_space<any>>) target(%124 : memref<1x128xf32, #tpu.memory_space<vmem>>) target_semaphore(%126 : memref<!tpu.dma_semaphore, #tpu.memory_space<semaphore_mem>>)
    %c7_i32 = arith.constant 7 : i32
    %127 = arith.addi %0, %c7_i32 : i32
    %128 = arith.index_cast %arg0 : i32 to index
    %129 = arith.index_cast %127 : i32 to index
    %130 = memref.load %arg2[%128, %129] : memref<2x8xi32, #tpu.memory_space<smem>>
    %c8_i32_56 = arith.constant 8 : i32
    %c0_i32_57 = arith.constant 0 : i32
    %131 = arith.cmpi eq, %c8_i32_56, %c0_i32_57 : i32
    %c1_i32_58 = arith.constant 1 : i32
    %132 = arith.select %131, %c1_i32_58, %c8_i32_56 : i32
    %133 = arith.remsi %c7_i32, %132 : i32
    %c0_i32_59 = arith.constant 0 : i32
    %134 = arith.cmpi ne, %133, %c0_i32_59 : i32
    %c0_i32_60 = arith.constant 0 : i32
    %135 = arith.cmpi slt, %133, %c0_i32_60 : i32
    %c0_i32_61 = arith.constant 0 : i32
    %136 = arith.cmpi slt, %132, %c0_i32_61 : i32
    %137 = arith.xori %135, %136 : i1
    %138 = arith.andi %137, %134 : i1
    %139 = arith.addi %133, %132 : i32
    %140 = arith.select %138, %139, %133 : i32
    %c0_i32_62 = arith.constant 0 : i32
    %141 = tpu.memref_slice %arg3[%130, %c0_i32_62] : memref<64x128xf32, #tpu.memory_space<any>> -> memref<1x128xf32, #tpu.memory_space<any>>
    %c0_i32_63 = arith.constant 0 : i32
    %142 = tpu.memref_slice %arg8[%c7_i32, %c0_i32_63] : memref<8x128xf32, #tpu.memory_space<vmem>> -> memref<1x128xf32, #tpu.memory_space<vmem>>
    %143 = tpu.memref_slice %arg9[%140] : memref<8x!tpu.dma_semaphore, #tpu.memory_space<semaphore_mem>> -> memref<1x!tpu.dma_semaphore, #tpu.memory_space<semaphore_mem>>
    %144 = tpu.memref_squeeze %143 : memref<1x!tpu.dma_semaphore, #tpu.memory_space<semaphore_mem>> -> memref<!tpu.dma_semaphore, #tpu.memory_space<semaphore_mem>>
    tpu.enqueue_dma source(%141 : memref<1x128xf32, #tpu.memory_space<any>>) target(%142 : memref<1x128xf32, #tpu.memory_space<vmem>>) target_semaphore(%144 : memref<!tpu.dma_semaphore, #tpu.memory_space<semaphore_mem>>)
    %c8_i32_64 = arith.constant 8 : i32
    %c0_i32_65 = arith.constant 0 : i32
    %c8_i32_66 = arith.constant 8 : i32
    %c0_i32_67 = arith.constant 0 : i32
    %145 = arith.cmpi eq, %c8_i32_66, %c0_i32_67 : i32
    %c1_i32_68 = arith.constant 1 : i32
    %146 = arith.select %145, %c1_i32_68, %c8_i32_66 : i32
    %147 = arith.remsi %c0_i32_65, %146 : i32
    %c0_i32_69 = arith.constant 0 : i32
    %148 = arith.cmpi ne, %147, %c0_i32_69 : i32
    %c0_i32_70 = arith.constant 0 : i32
    %149 = arith.cmpi slt, %147, %c0_i32_70 : i32
    %c0_i32_71 = arith.constant 0 : i32
    %150 = arith.cmpi slt, %146, %c0_i32_71 : i32
    %151 = arith.xori %149, %150 : i1
    %152 = arith.andi %151, %148 : i1
    %153 = arith.addi %147, %146 : i32
    %154 = arith.select %152, %153, %147 : i32
    %c0_i32_72 = arith.constant 0 : i32
    %c0_i32_73 = arith.constant 0 : i32
    %155 = tpu.memref_slice %arg3[%c0_i32_72, %c0_i32_73] : memref<64x128xf32, #tpu.memory_space<any>> -> memref<1x128xf32, #tpu.memory_space<any>>
    %c0_i32_74 = arith.constant 0 : i32
    %156 = tpu.memref_slice %arg8[%c0_i32_65, %c0_i32_74] : memref<8x128xf32, #tpu.memory_space<vmem>> -> memref<1x128xf32, #tpu.memory_space<vmem>>
    %157 = tpu.memref_slice %arg9[%154] : memref<8x!tpu.dma_semaphore, #tpu.memory_space<semaphore_mem>> -> memref<1x!tpu.dma_semaphore, #tpu.memory_space<semaphore_mem>>
    %158 = tpu.memref_squeeze %157 : memref<1x!tpu.dma_semaphore, #tpu.memory_space<semaphore_mem>> -> memref<!tpu.dma_semaphore, #tpu.memory_space<semaphore_mem>>
    tpu.wait_dma2 semaphore(%158 : memref<!tpu.dma_semaphore, #tpu.memory_space<semaphore_mem>>) src(%155 : memref<1x128xf32, #tpu.memory_space<any>>) dst(%156 : memref<1x128xf32, #tpu.memory_space<vmem>>)
    %c1_i32_75 = arith.constant 1 : i32
    %c8_i32_76 = arith.constant 8 : i32
    %c0_i32_77 = arith.constant 0 : i32
    %159 = arith.cmpi eq, %c8_i32_76, %c0_i32_77 : i32
    %c1_i32_78 = arith.constant 1 : i32
    %160 = arith.select %159, %c1_i32_78, %c8_i32_76 : i32
    %161 = arith.remsi %c1_i32_75, %160 : i32
    %c0_i32_79 = arith.constant 0 : i32
    %162 = arith.cmpi ne, %161, %c0_i32_79 : i32
    %c0_i32_80 = arith.constant 0 : i32
    %163 = arith.cmpi slt, %161, %c0_i32_80 : i32
    %c0_i32_81 = arith.constant 0 : i32
    %164 = arith.cmpi slt, %160, %c0_i32_81 : i32
    %165 = arith.xori %163, %164 : i1
    %166 = arith.andi %165, %162 : i1
    %167 = arith.addi %161, %160 : i32
    %168 = arith.select %166, %167, %161 : i32
    %c0_i32_82 = arith.constant 0 : i32
    %c0_i32_83 = arith.constant 0 : i32
    %169 = tpu.memref_slice %arg3[%c0_i32_82, %c0_i32_83] : memref<64x128xf32, #tpu.memory_space<any>> -> memref<1x128xf32, #tpu.memory_space<any>>
    %c0_i32_84 = arith.constant 0 : i32
    %170 = tpu.memref_slice %arg8[%c1_i32_75, %c0_i32_84] : memref<8x128xf32, #tpu.memory_space<vmem>> -> memref<1x128xf32, #tpu.memory_space<vmem>>
    %171 = tpu.memref_slice %arg9[%168] : memref<8x!tpu.dma_semaphore, #tpu.memory_space<semaphore_mem>> -> memref<1x!tpu.dma_semaphore, #tpu.memory_space<semaphore_mem>>
    %172 = tpu.memref_squeeze %171 : memref<1x!tpu.dma_semaphore, #tpu.memory_space<semaphore_mem>> -> memref<!tpu.dma_semaphore, #tpu.memory_space<semaphore_mem>>
    tpu.wait_dma2 semaphore(%172 : memref<!tpu.dma_semaphore, #tpu.memory_space<semaphore_mem>>) src(%169 : memref<1x128xf32, #tpu.memory_space<any>>) dst(%170 : memref<1x128xf32, #tpu.memory_space<vmem>>)
    %c2_i32_85 = arith.constant 2 : i32
    %c8_i32_86 = arith.constant 8 : i32
    %c0_i32_87 = arith.constant 0 : i32
    %173 = arith.cmpi eq, %c8_i32_86, %c0_i32_87 : i32
    %c1_i32_88 = arith.constant 1 : i32
    %174 = arith.select %173, %c1_i32_88, %c8_i32_86 : i32
    %175 = arith.remsi %c2_i32_85, %174 : i32
    %c0_i32_89 = arith.constant 0 : i32
    %176 = arith.cmpi ne, %175, %c0_i32_89 : i32
    %c0_i32_90 = arith.constant 0 : i32
    %177 = arith.cmpi slt, %175, %c0_i32_90 : i32
    %c0_i32_91 = arith.constant 0 : i32
    %178 = arith.cmpi slt, %174, %c0_i32_91 : i32
    %179 = arith.xori %177, %178 : i1
    %180 = arith.andi %179, %176 : i1
    %181 = arith.addi %175, %174 : i32
    %182 = arith.select %180, %181, %175 : i32
    %c0_i32_92 = arith.constant 0 : i32
    %c0_i32_93 = arith.constant 0 : i32
    %183 = tpu.memref_slice %arg3[%c0_i32_92, %c0_i32_93] : memref<64x128xf32, #tpu.memory_space<any>> -> memref<1x128xf32, #tpu.memory_space<any>>
    %c0_i32_94 = arith.constant 0 : i32
    %184 = tpu.memref_slice %arg8[%c2_i32_85, %c0_i32_94] : memref<8x128xf32, #tpu.memory_space<vmem>> -> memref<1x128xf32, #tpu.memory_space<vmem>>
    %185 = tpu.memref_slice %arg9[%182] : memref<8x!tpu.dma_semaphore, #tpu.memory_space<semaphore_mem>> -> memref<1x!tpu.dma_semaphore, #tpu.memory_space<semaphore_mem>>
    %186 = tpu.memref_squeeze %185 : memref<1x!tpu.dma_semaphore, #tpu.memory_space<semaphore_mem>> -> memref<!tpu.dma_semaphore, #tpu.memory_space<semaphore_mem>>
    tpu.wait_dma2 semaphore(%186 : memref<!tpu.dma_semaphore, #tpu.memory_space<semaphore_mem>>) src(%183 : memref<1x128xf32, #tpu.memory_space<any>>) dst(%184 : memref<1x128xf32, #tpu.memory_space<vmem>>)
    %c3_i32_95 = arith.constant 3 : i32
    %c8_i32_96 = arith.constant 8 : i32
    %c0_i32_97 = arith.constant 0 : i32
    %187 = arith.cmpi eq, %c8_i32_96, %c0_i32_97 : i32
    %c1_i32_98 = arith.constant 1 : i32
    %188 = arith.select %187, %c1_i32_98, %c8_i32_96 : i32
    %189 = arith.remsi %c3_i32_95, %188 : i32
    %c0_i32_99 = arith.constant 0 : i32
    %190 = arith.cmpi ne, %189, %c0_i32_99 : i32
    %c0_i32_100 = arith.constant 0 : i32
    %191 = arith.cmpi slt, %189, %c0_i32_100 : i32
    %c0_i32_101 = arith.constant 0 : i32
    %192 = arith.cmpi slt, %188, %c0_i32_101 : i32
    %193 = arith.xori %191, %192 : i1
    %194 = arith.andi %193, %190 : i1
    %195 = arith.addi %189, %188 : i32
    %196 = arith.select %194, %195, %189 : i32
    %c0_i32_102 = arith.constant 0 : i32
    %c0_i32_103 = arith.constant 0 : i32
    %197 = tpu.memref_slice %arg3[%c0_i32_102, %c0_i32_103] : memref<64x128xf32, #tpu.memory_space<any>> -> memref<1x128xf32, #tpu.memory_space<any>>
    %c0_i32_104 = arith.constant 0 : i32
    %198 = tpu.memref_slice %arg8[%c3_i32_95, %c0_i32_104] : memref<8x128xf32, #tpu.memory_space<vmem>> -> memref<1x128xf32, #tpu.memory_space<vmem>>
    %199 = tpu.memref_slice %arg9[%196] : memref<8x!tpu.dma_semaphore, #tpu.memory_space<semaphore_mem>> -> memref<1x!tpu.dma_semaphore, #tpu.memory_space<semaphore_mem>>
    %200 = tpu.memref_squeeze %199 : memref<1x!tpu.dma_semaphore, #tpu.memory_space<semaphore_mem>> -> memref<!tpu.dma_semaphore, #tpu.memory_space<semaphore_mem>>
    tpu.wait_dma2 semaphore(%200 : memref<!tpu.dma_semaphore, #tpu.memory_space<semaphore_mem>>) src(%197 : memref<1x128xf32, #tpu.memory_space<any>>) dst(%198 : memref<1x128xf32, #tpu.memory_space<vmem>>)
    %c4_i32_105 = arith.constant 4 : i32
    %c8_i32_106 = arith.constant 8 : i32
    %c0_i32_107 = arith.constant 0 : i32
    %201 = arith.cmpi eq, %c8_i32_106, %c0_i32_107 : i32
    %c1_i32_108 = arith.constant 1 : i32
    %202 = arith.select %201, %c1_i32_108, %c8_i32_106 : i32
    %203 = arith.remsi %c4_i32_105, %202 : i32
    %c0_i32_109 = arith.constant 0 : i32
    %204 = arith.cmpi ne, %203, %c0_i32_109 : i32
    %c0_i32_110 = arith.constant 0 : i32
    %205 = arith.cmpi slt, %203, %c0_i32_110 : i32
    %c0_i32_111 = arith.constant 0 : i32
    %206 = arith.cmpi slt, %202, %c0_i32_111 : i32
    %207 = arith.xori %205, %206 : i1
    %208 = arith.andi %207, %204 : i1
    %209 = arith.addi %203, %202 : i32
    %210 = arith.select %208, %209, %203 : i32
    %c0_i32_112 = arith.constant 0 : i32
    %c0_i32_113 = arith.constant 0 : i32
    %211 = tpu.memref_slice %arg3[%c0_i32_112, %c0_i32_113] : memref<64x128xf32, #tpu.memory_space<any>> -> memref<1x128xf32, #tpu.memory_space<any>>
    %c0_i32_114 = arith.constant 0 : i32
    %212 = tpu.memref_slice %arg8[%c4_i32_105, %c0_i32_114] : memref<8x128xf32, #tpu.memory_space<vmem>> -> memref<1x128xf32, #tpu.memory_space<vmem>>
    %213 = tpu.memref_slice %arg9[%210] : memref<8x!tpu.dma_semaphore, #tpu.memory_space<semaphore_mem>> -> memref<1x!tpu.dma_semaphore, #tpu.memory_space<semaphore_mem>>
    %214 = tpu.memref_squeeze %213 : memref<1x!tpu.dma_semaphore, #tpu.memory_space<semaphore_mem>> -> memref<!tpu.dma_semaphore, #tpu.memory_space<semaphore_mem>>
    tpu.wait_dma2 semaphore(%214 : memref<!tpu.dma_semaphore, #tpu.memory_space<semaphore_mem>>) src(%211 : memref<1x128xf32, #tpu.memory_space<any>>) dst(%212 : memref<1x128xf32, #tpu.memory_space<vmem>>)
    %c5_i32_115 = arith.constant 5 : i32
    %c8_i32_116 = arith.constant 8 : i32
    %c0_i32_117 = arith.constant 0 : i32
    %215 = arith.cmpi eq, %c8_i32_116, %c0_i32_117 : i32
    %c1_i32_118 = arith.constant 1 : i32
    %216 = arith.select %215, %c1_i32_118, %c8_i32_116 : i32
    %217 = arith.remsi %c5_i32_115, %216 : i32
    %c0_i32_119 = arith.constant 0 : i32
    %218 = arith.cmpi ne, %217, %c0_i32_119 : i32
    %c0_i32_120 = arith.constant 0 : i32
    %219 = arith.cmpi slt, %217, %c0_i32_120 : i32
    %c0_i32_121 = arith.constant 0 : i32
    %220 = arith.cmpi slt, %216, %c0_i32_121 : i32
    %221 = arith.xori %219, %220 : i1
    %222 = arith.andi %221, %218 : i1
    %223 = arith.addi %217, %216 : i32
    %224 = arith.select %222, %223, %217 : i32
    %c0_i32_122 = arith.constant 0 : i32
    %c0_i32_123 = arith.constant 0 : i32
    %225 = tpu.memref_slice %arg3[%c0_i32_122, %c0_i32_123] : memref<64x128xf32, #tpu.memory_space<any>> -> memref<1x128xf32, #tpu.memory_space<any>>
    %c0_i32_124 = arith.constant 0 : i32
    %226 = tpu.memref_slice %arg8[%c5_i32_115, %c0_i32_124] : memref<8x128xf32, #tpu.memory_space<vmem>> -> memref<1x128xf32, #tpu.memory_space<vmem>>
    %227 = tpu.memref_slice %arg9[%224] : memref<8x!tpu.dma_semaphore, #tpu.memory_space<semaphore_mem>> -> memref<1x!tpu.dma_semaphore, #tpu.memory_space<semaphore_mem>>
    %228 = tpu.memref_squeeze %227 : memref<1x!tpu.dma_semaphore, #tpu.memory_space<semaphore_mem>> -> memref<!tpu.dma_semaphore, #tpu.memory_space<semaphore_mem>>
    tpu.wait_dma2 semaphore(%228 : memref<!tpu.dma_semaphore, #tpu.memory_space<semaphore_mem>>) src(%225 : memref<1x128xf32, #tpu.memory_space<any>>) dst(%226 : memref<1x128xf32, #tpu.memory_space<vmem>>)
    %c6_i32_125 = arith.constant 6 : i32
    %c8_i32_126 = arith.constant 8 : i32
    %c0_i32_127 = arith.constant 0 : i32
    %229 = arith.cmpi eq, %c8_i32_126, %c0_i32_127 : i32
    %c1_i32_128 = arith.constant 1 : i32
    %230 = arith.select %229, %c1_i32_128, %c8_i32_126 : i32
    %231 = arith.remsi %c6_i32_125, %230 : i32
    %c0_i32_129 = arith.constant 0 : i32
    %232 = arith.cmpi ne, %231, %c0_i32_129 : i32
    %c0_i32_130 = arith.constant 0 : i32
    %233 = arith.cmpi slt, %231, %c0_i32_130 : i32
    %c0_i32_131 = arith.constant 0 : i32
    %234 = arith.cmpi slt, %230, %c0_i32_131 : i32
    %235 = arith.xori %233, %234 : i1
    %236 = arith.andi %235, %232 : i1
    %237 = arith.addi %231, %230 : i32
    %238 = arith.select %236, %237, %231 : i32
    %c0_i32_132 = arith.constant 0 : i32
    %c0_i32_133 = arith.constant 0 : i32
    %239 = tpu.memref_slice %arg3[%c0_i32_132, %c0_i32_133] : memref<64x128xf32, #tpu.memory_space<any>> -> memref<1x128xf32, #tpu.memory_space<any>>
    %c0_i32_134 = arith.constant 0 : i32
    %240 = tpu.memref_slice %arg8[%c6_i32_125, %c0_i32_134] : memref<8x128xf32, #tpu.memory_space<vmem>> -> memref<1x128xf32, #tpu.memory_space<vmem>>
    %241 = tpu.memref_slice %arg9[%238] : memref<8x!tpu.dma_semaphore, #tpu.memory_space<semaphore_mem>> -> memref<1x!tpu.dma_semaphore, #tpu.memory_space<semaphore_mem>>
    %242 = tpu.memref_squeeze %241 : memref<1x!tpu.dma_semaphore, #tpu.memory_space<semaphore_mem>> -> memref<!tpu.dma_semaphore, #tpu.memory_space<semaphore_mem>>
    tpu.wait_dma2 semaphore(%242 : memref<!tpu.dma_semaphore, #tpu.memory_space<semaphore_mem>>) src(%239 : memref<1x128xf32, #tpu.memory_space<any>>) dst(%240 : memref<1x128xf32, #tpu.memory_space<vmem>>)
    %c7_i32_135 = arith.constant 7 : i32
    %c8_i32_136 = arith.constant 8 : i32
    %c0_i32_137 = arith.constant 0 : i32
    %243 = arith.cmpi eq, %c8_i32_136, %c0_i32_137 : i32
    %c1_i32_138 = arith.constant 1 : i32
    %244 = arith.select %243, %c1_i32_138, %c8_i32_136 : i32
    %245 = arith.remsi %c7_i32_135, %244 : i32
    %c0_i32_139 = arith.constant 0 : i32
    %246 = arith.cmpi ne, %245, %c0_i32_139 : i32
    %c0_i32_140 = arith.constant 0 : i32
    %247 = arith.cmpi slt, %245, %c0_i32_140 : i32
    %c0_i32_141 = arith.constant 0 : i32
    %248 = arith.cmpi slt, %244, %c0_i32_141 : i32
    %249 = arith.xori %247, %248 : i1
    %250 = arith.andi %249, %246 : i1
    %251 = arith.addi %245, %244 : i32
    %252 = arith.select %250, %251, %245 : i32
    %c0_i32_142 = arith.constant 0 : i32
    %c0_i32_143 = arith.constant 0 : i32
    %253 = tpu.memref_slice %arg3[%c0_i32_142, %c0_i32_143] : memref<64x128xf32, #tpu.memory_space<any>> -> memref<1x128xf32, #tpu.memory_space<any>>
    %c0_i32_144 = arith.constant 0 : i32
    %254 = tpu.memref_slice %arg8[%c7_i32_135, %c0_i32_144] : memref<8x128xf32, #tpu.memory_space<vmem>> -> memref<1x128xf32, #tpu.memory_space<vmem>>
    %255 = tpu.memref_slice %arg9[%252] : memref<8x!tpu.dma_semaphore, #tpu.memory_space<semaphore_mem>> -> memref<1x!tpu.dma_semaphore, #tpu.memory_space<semaphore_mem>>
    %256 = tpu.memref_squeeze %255 : memref<1x!tpu.dma_semaphore, #tpu.memory_space<semaphore_mem>> -> memref<!tpu.dma_semaphore, #tpu.memory_space<semaphore_mem>>
    tpu.wait_dma2 semaphore(%256 : memref<!tpu.dma_semaphore, #tpu.memory_space<semaphore_mem>>) src(%253 : memref<1x128xf32, #tpu.memory_space<any>>) dst(%254 : memref<1x128xf32, #tpu.memory_space<vmem>>)
    %c8_i32_145 = arith.constant 8 : i32
    %c0 = arith.constant 0 : index
    %c0_146 = arith.constant 0 : index
    %257 = vector.load %arg8[%c0, %c0_146] : memref<8x128xf32, #tpu.memory_space<vmem>>, vector<8x128xf32>
    %c0_147 = arith.constant 0 : index
    %c0_148 = arith.constant 0 : index
    %258 = vector.load %arg4[%c0_147, %c0_148] : memref<8x128xf32, #tpu.memory_space<vmem>>, vector<8x128xf32>
    %259 = arith.addf %257, %258 : vector<8x128xf32>
    %cst = arith.constant dense<0.000000e+00> : vector<8xf32>
    %260 = vector.multi_reduction <add>, %259, %cst [1] : vector<8x128xf32> to vector<8xf32>
    %261 = vector.shape_cast %260 : vector<8xf32> to vector<8x1xf32>
    %262 = arith.mulf %259, %259 : vector<8x128xf32>
    %cst_149 = arith.constant dense<0.000000e+00> : vector<8xf32>
    %263 = vector.multi_reduction <add>, %262, %cst_149 [1] : vector<8x128xf32> to vector<8xf32>
    %264 = vector.shape_cast %263 : vector<8xf32> to vector<8x1xf32>
    %cst_150 = arith.constant 7.812500e-03 : f32
    %265 = vector.broadcast %cst_150 : f32 to vector<8x1xf32>
    %266 = arith.mulf %261, %265 : vector<8x1xf32>
    %cst_151 = arith.constant 7.812500e-03 : f32
    %267 = vector.broadcast %cst_151 : f32 to vector<8x1xf32>
    %268 = arith.mulf %264, %267 : vector<8x1xf32>
    %269 = arith.mulf %266, %266 : vector<8x1xf32>
    %270 = arith.subf %268, %269 : vector<8x1xf32>
    %271 = vector.broadcast %266 : vector<8x1xf32> to vector<8x128xf32>
    %272 = arith.subf %259, %271 : vector<8x128xf32>
    %cst_152 = arith.constant 9.99999996E-13 : f32
    %273 = vector.broadcast %cst_152 : f32 to vector<8x1xf32>
    %274 = arith.addf %270, %273 : vector<8x1xf32>
    %275 = math.rsqrt %274 : vector<8x1xf32>
    %276 = vector.broadcast %275 : vector<8x1xf32> to vector<8x128xf32>
    %277 = arith.mulf %272, %276 : vector<8x128xf32>
    %c0_153 = arith.constant 0 : index
    %c0_154 = arith.constant 0 : index
    %278 = vector.load %arg5[%c0_153, %c0_154] : memref<1x128xf32, #tpu.memory_space<vmem>>, vector<1x128xf32>
    %279 = vector.broadcast %278 : vector<1x128xf32> to vector<8x128xf32>
    %280 = arith.mulf %277, %279 : vector<8x128xf32>
    %c0_155 = arith.constant 0 : index
    %c0_156 = arith.constant 0 : index
    %281 = vector.load %arg6[%c0_155, %c0_156] : memref<1x128xf32, #tpu.memory_space<vmem>>, vector<1x128xf32>
    %282 = vector.broadcast %281 : vector<1x128xf32> to vector<8x128xf32>
    %283 = arith.addf %280, %282 : vector<8x128xf32>
    %c0_157 = arith.constant 0 : index
    %c0_158 = arith.constant 0 : index
    %284 = vector.load %arg7[%c0_157, %c0_158] : memref<8x128xf32, #tpu.memory_space<vmem>>, vector<8x128xf32>
    tpu.vector_store %arg7[%c0_157, %c0_158], %283 {strides = array<i32>} : memref<8x128xf32, #tpu.memory_space<vmem>>, vector<8x128xf32>,
    return
  }
  func.func @transform_1(%arg0: i32, %arg1: i32, %arg2: memref<2x8xi32, #tpu.memory_space<smem>>) -> (i32, i32) {
    %c0_i32 = arith.constant 0 : i32
    %c0_i32_0 = arith.constant 0 : i32
    return %arg1, %c0_i32 : i32, i32
  }
  func.func @transform_2(%arg0: i32, %arg1: i32, %arg2: memref<2x8xi32, #tpu.memory_space<smem>>) -> (i32, i32) {
    %c0_i32 = arith.constant 0 : i32
    %c0_i32_0 = arith.constant 0 : i32
    %c0_i32_1 = arith.constant 0 : i32
    return %c0_i32, %c0_i32_0 : i32, i32
  }
  func.func @transform_3(%arg0: i32, %arg1: i32, %arg2: memref<2x8xi32, #tpu.memory_space<smem>>) -> (i32, i32) {
    %c0_i32 = arith.constant 0 : i32
    %c0_i32_0 = arith.constant 0 : i32
    %c0_i32_1 = arith.constant 0 : i32
    return %c0_i32, %c0_i32_0 : i32, i32
  }
  func.func @transform_4(%arg0: i32, %arg1: i32, %arg2: memref<2x8xi32, #tpu.memory_space<smem>>) -> (i32, i32) {
    %c1_i32 = arith.constant 1 : i32
    %0 = arith.muli %arg0, %c1_i32 : i32
    %1 = arith.addi %0, %arg1 : i32
    %c0_i32 = arith.constant 0 : i32
    %c0_i32_0 = arith.constant 0 : i32
    return %1, %c0_i32 : i32, i32
  }
}

</mosaic_0001>

<bundles_post_ra>
// kernel: tpu_custom_call.1
= control target key start
LH: loop header
LB: loop body
LE: loop exit
PB: predicated region body
PF: predicated region fallthrough
CT: control target
= control target key end

     0   :  { %s1377_s0 = inlined_call_operand.hbm [shape: s32[2,8], index: 0, kind: input, shape index: {}]   ;;  %s1378_s1 = inlined_call_operand.hbm [shape: f32[64,128], index: 1, kind: input, shape index: {}]   ;;  %s1379_s2 = inlined_call_operand.hbm [shape: f32[16,128], index: 2, kind: input, shape index: {}]   ;;  %s1380_s3 = inlined_call_operand.vmem [shape: f32[1,128], index: 3, kind: input, shape index: {}]   ;;  %s1381_s4 = inlined_call_operand.vmem [shape: f32[1,128], index: 4, kind: input, shape index: {}]   ;;  %s1382_s5 = inlined_call_operand.hbm [shape: f32[16,128], index: 5, kind: output, shape index: {}]  }
   0x1   :  { %1390 = sst [smem:[#allocation42_spill]] %s1379_s2  ;;  %s700_s20 = scalar_lea.hbm %s1377_s0, 32 }
   0x2   :  { %p701_p0 = scmp.ne.s32.totalorder %s1377_s0, %s700_s20  ;;  %p704_p1 = scmp.lt.u32.totalorder %s700_s20, %s1377_s0 }
   0x4   :  { %p706_p2 = pnand %p704_p1, %p701_p0 }
   0x6   :  { %709 = shalt.err (!%p706_p2)  }
   0x7   :  { %s1032_s25 = smov [#allocation5]  }
   0x8   :  { %11 = dma.hbm_to_smem %s1377_s0, 32, %s1032_s25, [#allocation4] }
   0x9   :  { %982 = dma.done.wait [#allocation4], 32 }
   0xa   :  { %983 = vsyncadd [#allocation4], 4294967264 }
   0xb   :  { %13 = sfence }
   0xc   :  { %14 = vsyncpa [#allocation7], 0 }
   0xd   :  { %15 = vsyncpa [#allocation8], 0 }
   0xe   :  { %17 = vsyncpa [#allocation8 + $0x1], 0  ;;  %s1085_s28 = smov 0   ;;  %s1087_s29 = smov 0  }
   0xf   :  { %s1089_s30 = smov 0   ;;  %s1091_s6 = smov 0  }
  0x10   :  { %s1093_s7 = smov 0   ;;  %s1095_s8 = smov 0  }
  0x11 LB: > { %1391 = sst [smem:[#allocation39_spill]] %s1026_s7  ;;  %s586_s0 = sadd.s32 4294967295, %s1030_s8   ;;  %s1030_s8 = sphi %s1095_s8, %s23_s8   ;;  %s1026_s7 = sphi %s1093_s7, %s1407_s7   ;;  %s1022_s6 = sphi %s1091_s6, %s1406_s6   ;;  %s1018_s30 = sphi %s1089_s30, %s1410_s30   ;;  %s1014_s29 = sphi %s1087_s29, %s1409_s29   ;;  %s1010_s28 = sphi %s1085_s28, %s1408_s28  }
  0x12   : > { %s587_s9 = sadd.s32 4294967294, %s1030_s8   ;;  %s35_s10 = sadd.s32 1, %s1026_s7 }
  0x13   : > { %s112_s11 = sadd.s32 1, %s1018_s30  ;;  %p37_p3 = scmp.ge.s32.totalorder %s35_s10, 2 }
  0x14   : > { %p122_p4 = scmp.ne.s32.totalorder %s1018_s30, %s1014_s29  ;;  %p123_p5 = scmp.eq.s32.totalorder %s586_s0, 1 }
  0x15   : > { %p128_p6 = scmp.ne.s32.totalorder %s1014_s29, %s1010_s28  ;;  %s1412_s10 = smov (%p37_p3, %s35_s10), 0 }
  0x16   : > { %1392 = sst [smem:[#allocation40_spill]] %s1412_s10  ;;  %p1125_p7 = por %p123_p5, %p122_p4 }
  0x17   : > { %p129_p8 = scmp.eq.s32.totalorder %s587_s9, 1  ;;  %s109_s13 = ssub.s32 %s1026_s7, %s1412_s10 }
  0x18   : > { %s1393_s12 = scalar_select %p1125_p7, 1, 0 }
  0x19   : > { %p588_p9 = scmp.ge.s32.totalorder %s1030_s8, 1  ;;  %p110_p10 = scmp.eq.s32.totalorder %s109_s13, 0 }
  0x1a   : > { %p1132_p11 = por %p129_p8, %p128_p6  ;;  %p136_p12 = scmp.lt.s32.totalorder %s1030_s8, 3 }
  0x1b   : > { %s1138_s15 = scalar_select %p110_p10, %s1018_s30, %s112_s11  }
  0x1c   : > { %s1394_s14 = scalar_select %p1132_p11, 1, 0 }
  0x1d   : > { %1395 = sst [smem:[#allocation41_spill]] %s1138_s15  ;;  %p1140_p13 = pnand %p588_p9, %p136_p12 }
  0x1e   : > { %p1144_p0 = scmp.eq.s32.totalorder %s586_s0, 0  ;;  %s1033_s18 = smov [#allocation6]  }
  0x1f   : > { %s1396_s16 = scalar_select %p1140_p13, 1, 0 }
  0x20   : > { %s1397_s17 = scalar_select %p1144_p0, 1, 0 }
  0x21   : > { %p629_p1 = pneg %p1140_p13  ;;  %s151_s19 = sshll.u32 %s1033_s18, 4  ;;  %s152_s19 = int_to_ptr.vmem [resolvable:$true] %s151_s19 }
  0x22   : > { %s1399_s2 = sld [smem:[#allocation42_spill]] }
  0x23   : > { %p1152_p2 = pnand %p1144_p0, %p629_p1 }
  0x25   : > { %p712_p4 = pneg %p1152_p2 }
  0x28   : > { %s710_s23 = scalar_lea.hbm %s1399_s2, 128  ;;  %s715_s0 = scalar_lea.hbm %s1399_s2, 256 }
  0x29   : > { %p711_p3 = scmp.ne.s32.totalorder %s1399_s2, %s710_s23  ;;  %p716_p8 = scmp.lt.u32.totalorder %s715_s0, %s710_s23 }
  0x2a   : > { %p717_p9 = scmp.lt.u32.totalorder %s710_s23, %s1399_s2 }
  0x2b   : > { %p713_p5 = pnand %p712_p4, %p711_p3 }
  0x2c   : > { %p718_p10 = por %p717_p9, %p716_p8 }
  0x2d   : > { %p714_p6 = pneg %p713_p5 }
  0x2f   : > { %p719_p12 = pnand %p718_p10, %p714_p6 }
  0x31   : > { %722 = shalt.err (!%p719_p12)
}
  0x32   : > { %s723_s13 = scalar_lea.vmem %s152_s19, 128  ;;  %p731_p0 = scmp.lt.s32.totalorder %s152_s19, %s152_s19 }
  0x33   : > { %p724_p1 = scmp.ne.s32.totalorder %s152_s19, %s723_s13  ;;  %p732_p13 = scmp.lt.s32.totalorder %s723_s13, %s723_s13 }
  0x35   : > { %p726_p11 = pnand %p724_p1, %p712_p4  ;;  %p733_p3 = por %p732_p13, %p731_p0 }
  0x37   : > { %p727_p7 = pneg %p726_p11 }
  0x39   : > { %p734_p5 = pnand %p733_p3, %p727_p7 }
  0x3b   : > { %737 = shalt.err (!%p734_p5)
}
  0x3c   : > { %632 = dma.hbm_to_vmem [thread:$0]  (!%p1152_p2), %s1399_s2, 128, %s152_s19, [#allocation7]  }
  0x3d   : > { %p1400_p8 = scmp.ne.s32.totalorder %s1396_s16, 0 }
  0x3e   : > { %p1401_p6 = scmp.ne.s32.totalorder (!%p1400_p8), %s1397_s17, 0 }
  0x3f   : > { %170 = sbr.rel (%p1400_p8) target bundleno = 454 (0x1c6), region = 32 }
  0x46   : > { %985 = dma.done.wait (%p1401_p6), [#allocation7], 128  }
  0x47   : > { %987 = vsyncadd (%p1401_p6), [#allocation7], 4294967168  ;;  %s1387_s22 = sand.u32 1, %s1014_s29   ;;  %s1183_s23 = sshll.u32 %s1022_s6, 7 }
  0x48   : > { %s1187_s19 = sshll.u32 %s1387_s22, 3  ;;  %s198_s16 = sld [smem:[#allocation5 + %s1183_s23]] }
  0x49   : > { %s1034_s20 = smov [#allocation2]   ;;  %s219_s25 = sadd.s32 1, %s1183_s23 }
  0x4a   : > { %s208_s24 = sshll.u32 %s1034_s20, 4  ;;  %s1193_s17 = sld [smem:[#allocation5 + %s219_s25]]  ;;  %s1191_s24 = int_to_ptr.vmem [resolvable:$true] %s208_s24 }
  0x4b   : > { %s243_s26 = sadd.s32 2, %s1183_s23  ;;  %s1035_s27 = smov [#allocation2 + $0x1]  }
  0x4c   : > { %s232_s0 = sshll.u32 %s1035_s27, 4  ;;  %s1196_s9 = sld [smem:[#allocation5 + %s243_s26]]  ;;  %s1198_s0 = int_to_ptr.vmem [resolvable:$true] %s232_s0 }
  0x4d   : > { %s1206_s2 = scalar_lea.hbm %s1378_s1, 1024 }
  0x4e   : > { %s594_s6 = sshll.u32 %s198_s16, 4 }
  0x4f   : > { %s200_s18 = scalar_lea.hbm %s1378_s1, %s594_s6 }
  0x50   : > { %s738_s21 = scalar_lea.hbm %s200_s18, 16  ;;  %p741_p11 = scmp.lt.u32.totalorder %s200_s18, %s1378_s1 }
  0x51   : > { %p739_p7 = scmp.ne.s32.totalorder %s200_s18, %s738_s21  ;;  %p742_p13 = scmp.lt.u32.totalorder %s1206_s2, %s738_s21 }
  0x52   : > { %p744_p2 = scmp.lt.u32.totalorder %s738_s21, %s200_s18 }
  0x53   : > { %p743_p0 = por %p742_p13, %p741_p11 }
  0x55   : > { %p745_p4 = por %p744_p2, %p743_p0 }
  0x57   : > { %p746_p9 = pnand %p745_p4, %p739_p7 }
  0x59   : > { %749 = shalt.err (!%p746_p9)  }
  0x5a   : > { %s750_s16 = scalar_lea.vmem %s1191_s24, 16  ;;  %s1215_s22 = scalar_lea.vmem %s1191_s24, 128 }
  0x5b   : > { %p751_p10 = scmp.ne.s32.totalorder %s1191_s24, %s750_s16  ;;  %p755_p12 = scmp.lt.s32.totalorder %s1191_s24, %s1191_s24 }
  0x5c   : > { %p756_p1 = scmp.lt.s32.totalorder %s1215_s22, %s750_s16 }
  0x5e   : > { %p757_p3 = por %p756_p1, %p755_p12 }
  0x60   : > { %p758_p5 = pnand %p757_p3, %p751_p10 }
  0x62   : > { %761 = shalt.err (!%p758_p5)  }
  0x63   : > { %211 = dma.hbm_to_vmem [thread:$0]  %s200_s18, 16, %s1191_s24, [#allocation3] }
  0x64   : > { %s596_s10 = sshll.u32 %s1193_s17, 4  ;;  %s1036_s26 = smov [#allocation2 + $0x2]  }
  0x65   : > { %s256_s27 = sshll.u32 %s1036_s26, 4  ;;  %s222_s13 = scalar_lea.hbm %s1378_s1, %s596_s10  ;;  %s1225_s27 = int_to_ptr.vmem [resolvable:$true] %s256_s27 }
  0x66   : > { %s762_s21 = scalar_lea.hbm %s222_s13, 16  ;;  %p765_p6 = scmp.lt.u32.totalorder %s222_s13, %s1378_s1 }
  0x67   : > { %p763_p8 = scmp.ne.s32.totalorder %s222_s13, %s762_s21  ;;  %p766_p7 = scmp.lt.u32.totalorder %s1206_s2, %s762_s21 }
  0x68   : > { %p768_p13 = scmp.lt.u32.totalorder %s762_s21, %s222_s13 }
  0x69   : > { %p767_p11 = por %p766_p7, %p765_p6 }
  0x6b   : > { %p769_p0 = por %p768_p13, %p767_p11 }
  0x6d   : > { %p770_p2 = pnand %p769_p0, %p763_p8 }
  0x6f   : > { %773 = shalt.err (!%p770_p2)  }
  0x70   : > { %s774_s17 = scalar_lea.vmem %s1198_s0, 16  ;;  %p779_p9 = scmp.lt.s32.totalorder %s1198_s0, %s1191_s24 }
  0x71   : > { %p775_p4 = scmp.ne.s32.totalorder %s1198_s0, %s774_s17  ;;  %p780_p10 = scmp.lt.s32.totalorder %s1215_s22, %s774_s17 }
  0x73   : > { %p781_p12 = por %p780_p10, %p779_p9 }
  0x75   : > { %p782_p1 = pnand %p781_p12, %p775_p4 }
  0x77   : > { %785 = shalt.err (!%p782_p1)  }
  0x78   : > { %235 = dma.hbm_to_vmem [thread:$0]  %s222_s13, 16, %s1198_s0, [#allocation3 + $0x1] }
  0x79   : > { %s598_s18 = sshll.u32 %s1196_s9, 4  ;;  %s267_s16 = sadd.s32 3, %s1183_s23 }
  0x7a   : > { %s246_s6 = scalar_lea.hbm %s1378_s1, %s598_s18  ;;  %s1242_s11 = sld [smem:[#allocation5 + %s267_s16]] }
  0x7b   : > { %s786_s21 = scalar_lea.hbm %s246_s6, 16  ;;  %p789_p5 = scmp.lt.u32.totalorder %s246_s6, %s1378_s1 }
  0x7c   : > { %p787_p3 = scmp.ne.s32.totalorder %s246_s6, %s786_s21  ;;  %p790_p8 = scmp.lt.u32.totalorder %s1206_s2, %s786_s21 }
  0x7d   : > { %p792_p7 = scmp.lt.u32.totalorder %s786_s21, %s246_s6 }
  0x7e   : > { %p791_p6 = por %p790_p8, %p789_p5 }
  0x80   : > { %p793_p11 = por %p792_p7, %p791_p6 }
  0x82   : > { %p794_p13 = pnand %p793_p11, %p787_p3 }
  0x84   : > { %797 = shalt.err (!%p794_p13)  }
  0x85   : > { %s798_s0 = scalar_lea.vmem %s1225_s27, 16  ;;  %p803_p2 = scmp.lt.s32.totalorder %s1225_s27, %s1191_s24 }
  0x86   : > { %p799_p0 = scmp.ne.s32.totalorder %s1225_s27, %s798_s0  ;;  %p804_p4 = scmp.lt.s32.totalorder %s1215_s22, %s798_s0 }
  0x88   : > { %p805_p9 = por %p804_p4, %p803_p2 }
  0x8a   : > { %p806_p10 = pnand %p805_p9, %p799_p0 }
  0x8c   : > { %809 = shalt.err (!%p806_p10)  }
  0x8d   : > { %259 = dma.hbm_to_vmem [thread:$0]  %s246_s6, 16, %s1225_s27, [#allocation3 + $0x2] }
  0x8e   : > { %s291_s9 = sadd.s32 4, %s1183_s23  ;;  %s1037_s13 = smov [#allocation2 + $0x3]  }
  0x8f   : > { %s280_s17 = sshll.u32 %s1037_s13, 4  ;;  %s292_s18 = sld [smem:[#allocation5 + %s291_s9]]  ;;  %s281_s17 = int_to_ptr.vmem [resolvable:$true] %s280_s17 }
  0x90   : > { %s1038_s16 = smov [#allocation2 + $0x4]   ;;  %s315_s26 = sadd.s32 5, %s1183_s23 }
  0x91   : > { %s304_s10 = sshll.u32 %s1038_s16, 4  ;;  %s600_s21 = sshll.u32 %s1242_s11, 4  ;;  %s1257_s10 = int_to_ptr.vmem [resolvable:$true] %s304_s10 }
  0x92   : > { %s270_s0 = scalar_lea.hbm %s1378_s1, %s600_s21  ;;  %s1262_s7 = sld [smem:[#allocation5 + %s315_s26]] }
  0x93   : > { %s810_s15 = scalar_lea.hbm %s270_s0, 16  ;;  %p813_p1 = scmp.lt.u32.totalorder %s270_s0, %s1378_s1 }
  0x94   : > { %p811_p12 = scmp.ne.s32.totalorder %s270_s0, %s810_s15  ;;  %p814_p3 = scmp.lt.u32.totalorder %s1206_s2, %s810_s15 }
  0x95   : > { %p816_p8 = scmp.lt.u32.totalorder %s810_s15, %s270_s0 }
  0x96   : > { %p815_p5 = por %p814_p3, %p813_p1 }
  0x98   : > { %p817_p6 = por %p816_p8, %p815_p5 }
  0x9a   : > { %p818_p7 = pnand %p817_p6, %p811_p12 }
  0x9c   : > { %821 = shalt.err (!%p818_p7)  }
  0x9d   : > { %s822_s11 = scalar_lea.vmem %s281_s17, 16  ;;  %p827_p13 = scmp.lt.s32.totalorder %s281_s17, %s1191_s24 }
  0x9e   : > { %p823_p11 = scmp.ne.s32.totalorder %s281_s17, %s822_s11  ;;  %p828_p0 = scmp.lt.s32.totalorder %s1215_s22, %s822_s11 }
  0xa0   : > { %p829_p2 = por %p828_p0, %p827_p13 }
  0xa2   : > { %p830_p4 = pnand %p829_p2, %p823_p11 }
  0xa4   : > { %833 = shalt.err (!%p830_p4)  }
  0xa5   : > { %283 = dma.hbm_to_vmem [thread:$0]  %s270_s0, 16, %s281_s17, [#allocation3 + $0x3] }
  0xa6   : > { %s602_s9 = sshll.u32 %s292_s18, 4  ;;  %s1039_s15 = smov [#allocation2 + $0x5]  }
  0xa7   : > { %s294_s26 = scalar_lea.hbm %s1378_s1, %s602_s9  ;;  %s328_s21 = sshll.u32 %s1039_s15, 4  ;;  %s329_s21 = int_to_ptr.vmem [resolvable:$true] %s328_s21 }
  0xa8   : > { %s834_s20 = scalar_lea.hbm %s294_s26, 16  ;;  %p837_p10 = scmp.lt.u32.totalorder %s294_s26, %s1378_s1 }
  0xa9   : > { %p835_p9 = scmp.ne.s32.totalorder %s294_s26, %s834_s20  ;;  %p838_p12 = scmp.lt.u32.totalorder %s1206_s2, %s834_s20 }
  0xaa   : > { %p840_p3 = scmp.lt.u32.totalorder %s834_s20, %s294_s26 }
  0xab   : > { %p839_p1 = por %p838_p12, %p837_p10 }
  0xad   : > { %p841_p5 = por %p840_p3, %p839_p1 }
  0xaf   : > { %p842_p8 = pnand %p841_p5, %p835_p9 }
  0xb1   : > { %845 = shalt.err (!%p842_p8)  }
  0xb2   : > { %s846_s17 = scalar_lea.vmem %s1257_s10, 16  ;;  %p851_p7 = scmp.lt.s32.totalorder %s1257_s10, %s1191_s24 }
  0xb3   : > { %p847_p6 = scmp.ne.s32.totalorder %s1257_s10, %s846_s17  ;;  %p852_p11 = scmp.lt.s32.totalorder %s1215_s22, %s846_s17 }
  0xb5   : > { %p853_p13 = por %p852_p11, %p851_p7 }
  0xb7   : > { %p854_p0 = pnand %p853_p13, %p847_p6 }
  0xb9   : > { %857 = shalt.err (!%p854_p0)  }
  0xba   : > { %307 = dma.hbm_to_vmem [thread:$0]  %s294_s26, 16, %s1257_s10, [#allocation3 + $0x4] }
  0xbb   : > { %s339_s18 = sadd.s32 6, %s1183_s23  ;;  %s604_s0 = sshll.u32 %s1262_s7, 4 }
  0xbc   : > { %s340_s6 = sld [smem:[#allocation5 + %s339_s18]]  ;;  %s318_s13 = scalar_lea.hbm %s1378_s1, %s604_s0 }
  0xbd   : > { %s858_s16 = scalar_lea.hbm %s318_s13, 16  ;;  %p861_p4 = scmp.lt.u32.totalorder %s318_s13, %s1378_s1 }
  0xbe   : > { %p859_p2 = scmp.ne.s32.totalorder %s318_s13, %s858_s16  ;;  %p862_p9 = scmp.lt.u32.totalorder %s1206_s2, %s858_s16 }
  0xbf   : > { %p864_p12 = scmp.lt.u32.totalorder %s858_s16, %s318_s13 }
  0xc0   : > { %p863_p10 = por %p862_p9, %p861_p4 }
  0xc2   : > { %p865_p1 = por %p864_p12, %p863_p10 }
  0xc4   : > { %p866_p3 = pnand %p865_p1, %p859_p2 }
  0xc6   : > { %869 = shalt.err (!%p866_p3)  }
  0xc7   : > { %s870_s10 = scalar_lea.vmem %s329_s21, 16  ;;  %p875_p8 = scmp.lt.s32.totalorder %s329_s21, %s1191_s24 }
  0xc8   : > { %p871_p5 = scmp.ne.s32.totalorder %s329_s21, %s870_s10  ;;  %p876_p6 = scmp.lt.s32.totalorder %s1215_s22, %s870_s10 }
  0xca   : > { %p877_p7 = por %p876_p6, %p875_p8 }
  0xcc   : > { %p878_p11 = pnand %p877_p7, %p871_p5 }
  0xce   : > { %881 = shalt.err (!%p878_p11)  }
  0xcf   : > { %331 = dma.hbm_to_vmem [thread:$0]  %s318_s13, 16, %s329_s21, [#allocation3 + $0x5] }
  0xd0   : > { %s1040_s7 = smov [#allocation2 + $0x6]   ;;  %s363_s25 = sadd.s32 7, %s1183_s23 }
  0xd1   : > { %s352_s26 = sshll.u32 %s1040_s7, 4  ;;  %s364_s27 = sld [smem:[#allocation5 + %s363_s25]]  ;;  %s353_s26 = int_to_ptr.vmem [resolvable:$true] %s352_s26 }
  0xd2   : > { %s606_s17 = sshll.u32 %s340_s6, 4  ;;  %s1041_s18 = smov [#allocation2 + $0x7]  }
  0xd3   : > { %s376_s0 = sshll.u32 %s1041_s18, 4  ;;  %s342_s16 = scalar_lea.hbm %s1378_s1, %s606_s17  ;;  %s377_s0 = int_to_ptr.vmem [resolvable:$true] %s376_s0 }
  0xd4   : > { %s882_s15 = scalar_lea.hbm %s342_s16, 16  ;;  %p885_p0 = scmp.lt.u32.totalorder %s342_s16, %s1378_s1 }
  0xd5   : > { %p883_p13 = scmp.ne.s32.totalorder %s342_s16, %s882_s15  ;;  %p886_p2 = scmp.lt.u32.totalorder %s1206_s2, %s882_s15 }
  0xd6   : > { %p888_p9 = scmp.lt.u32.totalorder %s882_s15, %s342_s16 }
  0xd7   : > { %p887_p4 = por %p886_p2, %p885_p0 }
  0xd9   : > { %p889_p10 = por %p888_p9, %p887_p4 }
  0xdb   : > { %p890_p12 = pnand %p889_p10, %p883_p13 }
  0xdd   : > { %893 = shalt.err (!%p890_p12)  }
  0xde   : > { %s894_s21 = scalar_lea.vmem %s353_s26, 16  ;;  %p899_p3 = scmp.lt.s32.totalorder %s353_s26, %s1191_s24 }
  0xdf   : > { %p895_p1 = scmp.ne.s32.totalorder %s353_s26, %s894_s21  ;;  %p900_p5 = scmp.lt.s32.totalorder %s1215_s22, %s894_s21 }
  0xe1   : > { %p901_p8 = por %p900_p5, %p899_p3 }
  0xe3   : > { %p902_p6 = pnand %p901_p8, %p895_p1 }
  0xe5   : > { %905 = shalt.err (!%p902_p6)  }
  0xe6   : > { %355 = dma.hbm_to_vmem [thread:$0]  %s342_s16, 16, %s353_s26, [#allocation3 + $0x6] }
  0xe7   : > { %s608_s6 = sshll.u32 %s364_s27, 4 }
  0xe8   : > { %s366_s25 = scalar_lea.hbm %s1378_s1, %s608_s6 }
  0xe9   : > { %s906_s17 = scalar_lea.hbm %s366_s25, 16  ;;  %p909_p11 = scmp.lt.u32.totalorder %s366_s25, %s1378_s1 }
  0xea   : > { %p907_p7 = scmp.ne.s32.totalorder %s366_s25, %s906_s17  ;;  %p910_p13 = scmp.lt.u32.totalorder %s1206_s2, %s906_s17 }
  0xeb   : > { %p912_p2 = scmp.lt.u32.totalorder %s906_s17, %s366_s25 }
  0xec   : > { %p911_p0 = por %p910_p13, %p909_p11 }
  0xee   : > { %p913_p4 = por %p912_p2, %p911_p0 }
  0xf0   : > { %p914_p9 = pnand %p913_p4, %p907_p7 }
  0xf2   : > { %917 = shalt.err (!%p914_p9)  }
  0xf3   : > { %s918_s26 = scalar_lea.vmem %s377_s0, 16  ;;  %p923_p12 = scmp.lt.s32.totalorder %s377_s0, %s1191_s24 }
  0xf4   : > { %p919_p10 = scmp.ne.s32.totalorder %s377_s0, %s918_s26  ;;  %p924_p1 = scmp.lt.s32.totalorder %s1215_s22, %s918_s26 }
  0xf6   : > { %p925_p3 = por %p924_p1, %p923_p12 }
  0xf8   : > { %p926_p5 = pnand %p925_p3, %p919_p10 }
  0xfa   : > { %929 = shalt.err (!%p926_p5)  }
  0xfb   : > { %379 = dma.hbm_to_vmem [thread:$0]  %s366_s25, 16, %s377_s0, [#allocation3 + $0x7] }
  0xfc   : > { %s188_s27 = scalar_lea.vmem [#allocation9], %s1187_s19 }
  0xfd   : > { %988 = dma.done.wait [#allocation3], 16 }
  0xfe   : > { %989 = vsyncadd [#allocation3], 4294967280 }
  0xff   : > { %990 = dma.done.wait [#allocation3 + $0x1], 16 }
 0x100   : > { %991 = vsyncadd [#allocation3 + $0x1], 4294967280 }
 0x101   : > { %992 = dma.done.wait [#allocation3 + $0x2], 16 }
 0x102   : > { %993 = vsyncadd [#allocation3 + $0x2], 4294967280 }
 0x103   : > { %994 = dma.done.wait [#allocation3 + $0x3], 16 }
 0x104   : > { %995 = vsyncadd [#allocation3 + $0x3], 4294967280 }
 0x105   : > { %996 = dma.done.wait [#allocation3 + $0x4], 16 }
 0x106   : > { %997 = vsyncadd [#allocation3 + $0x4], 4294967280 }
 0x107   : > { %998 = dma.done.wait [#allocation3 + $0x5], 16 }
 0x108   : > { %999 = vsyncadd [#allocation3 + $0x5], 4294967280 }
 0x109   : > { %1000 = dma.done.wait [#allocation3 + $0x6], 16 }
 0x10a   : > { %1001 = vsyncadd [#allocation3 + $0x6], 4294967280 }
 0x10b   : > { %1002 = dma.done.wait [#allocation3 + $0x7], 16 }
 0x10c   : > { %1003 = vsyncadd [#allocation3 + $0x7], 4294967280  ;;  %v397_v0 = vld [vmem:[#allocation2] sm:$0xff]  ;;  %v398_v1 = vld [vmem:[#allocation6] sm:$0xff]  ;;  %s445_s9 = sshll.u32 %s188_s27, 4  ;;  %s1326_s20 = scalar_lea.hbm %s1382_s5, %s1183_s23  ;;  %s1328_s9 = int_to_ptr.vmem [resolvable:$true] %s445_s9 }
 0x10d   : > { %v399_v2 = vadd.f32 %v398_v1, %v397_v0  ;;  %v609_v13 = vld [vmem:[%s1380_s3] ss:$0 sm:$0xff]  ;;  %s1402_s10 = sand.u32 1, %s1014_s29   ;;  %s930_s6 = scalar_lea.vmem %s1328_s9, 128 }
 0x10e   : > { %v610_v15 = vld [vmem:[%s1381_s4] ss:$0 sm:$0xff]  ;;  %s431_s21 = scalar_lea.sflag [#allocation8], %s1402_s10  ;;  %p931_p8 = scmp.ne.s32.totalorder %s1328_s9, %s930_s6 }
 0x10f   : > { %400 = vadd.xlane.f32.xlu0 %v399_v2  ;;  %v402_v3 = vmul.f32 %v399_v2, %v399_v2  ;;  %p1403_p6 = scmp.ne.s32.totalorder %s1393_s12, 0  ;;  %s1042_s13 = smov [#allocation9]  }
 0x110   : > { %s934_s7 = sshll.u32 %s1042_s13, 4  ;;  %s935_s7 = int_to_ptr.vmem [resolvable:$false] %s934_s7 }
 0x111   : > { %p932_p7 = pnand %p931_p8, %p1403_p6  ;;  %s936_s25 = scalar_lea.vmem %s935_s7, 256 }
 0x112   : > { %p937_p13 = scmp.lt.s32.totalorder %s1328_s9, %s935_s7  ;;  %p938_p0 = scmp.lt.s32.totalorder %s936_s25, %s930_s6 }
 0x113   : > { %403 = vadd.xlane.f32.xlu0 %v402_v3  ;;  %p933_p11 = pneg %p932_p7 }
 0x114   : > { %p939_p2 = por %p938_p0, %p937_p13 }
 0x116   : > { %p940_p4 = pnand %p939_p2, %p933_p11 }
 0x19c   : > { %v401_v4 = vpop.xlane.xlu0 %400 }
 0x19d   : > { %v405_v5 = vmul.f32 0.0078125, %v401_v4 }
 0x19f   : > { %v407_v7 = vmul.f32 %v405_v5, %v405_v5  ;;  %v409_v11 = vsub.f32 %v399_v2, %v405_v5 }
 0x1a0   : > { %v404_v6 = vpop.xlane.xlu0 %403 }
 0x1a1   : > { %v406_v8 = vmul.f32 0.0078125, %v404_v6 }
 0x1a3   : > { %v408_v9 = vsub.f32 %v406_v8, %v407_v7 }
 0x1a5   : > { %v410_v10 = vadd.f32 1e-12, %v408_v9 }
 0x1a7   : > { %698 = vrsqrt.f32 %v410_v10 }
 0x1b1   : > { %v699_v12 = vpop.eup %698 }
 0x1b2   : > { %v412_v14 = vmul.f32 %v699_v12, %v409_v11 }
 0x1b4   : > { %v420_v16 = vmul.f32 %v609_v13, %v412_v14 }
 0x1b6   : > { %v428_v17 = vadd.f32 %v610_v15, %v420_v16 }
 0x1b8   : > { %429 = vst [vmem:[%s188_s27] sm:$0xff] %v428_v17 }
 0x1b9   : > { %943 = shalt.err (!%p940_p4)
}
 0x1ba   : > { %s944_s23 = scalar_lea.hbm %s1326_s20, 128  ;;  %s948_s18 = scalar_lea.hbm %s1382_s5, 256 }
 0x1bb   : > { %p945_p9 = scmp.ne.s32.totalorder %s1326_s20, %s944_s23  ;;  %p949_p1 = scmp.lt.u32.totalorder %s1326_s20, %s1382_s5 }
 0x1bc   : > { %p950_p3 = scmp.lt.u32.totalorder %s948_s18, %s944_s23  ;;  %p952_p8 = scmp.lt.u32.totalorder %s944_s23, %s1326_s20 }
 0x1bd   : > { %p946_p10 = pnand %p945_p9, %p1403_p6 }
 0x1be   : > { %p951_p5 = por %p950_p3, %p949_p1 }
 0x1bf   : > { %p947_p12 = pneg %p946_p10 }
 0x1c0   : > { %p953_p7 = por %p952_p8, %p951_p5 }
 0x1c2   : > { %p954_p11 = pnand %p953_p7, %p947_p12 }
 0x1c4   : > { %957 = shalt.err (!%p954_p11)
}
 0x1c5   : > { %627 = dma.vmem_to_hbm [thread:$0]  (%p1403_p6), %s1328_s9, 128, %s1326_s20, %s431_s21  }
 0x1c6 PF: > { %p639_p13 = scmp.ge.s32.totalorder %s1030_s8, 2  ;;  %s457_s27 = sand.u32 1, %s1010_s28  }
 0x1c7   : > { %p1404_p0 = scmp.ne.s32.totalorder %s1394_s14, 0  ;;  %s458_s2 = scalar_lea.sflag [#allocation8], %s457_s27 }
 0x1c9   : > { %p634_p2 = pnand %p639_p13, %p1404_p0 }
 0x1cb   : > { %1005 = dma.done.wait (!%p634_p2), %s458_s2, 128  }
 0x1cc   : > { %1007 = vsyncadd (!%p634_p2), %s458_s2, 4294967168  ;;  %s23_s8 = sadd.s32 1, %s1030_s8   ;;  %s1405_s12 = sld [smem:[#allocation41_spill]] }
 0x1cd   : > { %p20_p4 = scmp.ge.s32.totalorder %s23_s8, 4   ;;  %s1406_s6 = sld [smem:[#allocation39_spill]] }
 0x1ce   : > { %s1407_s7 = sld [smem:[#allocation40_spill]]  ;;  %s1408_s28 = smov %s1014_s29 }
 0x1cf   : > { %s1409_s29 = smov %s1018_s30  ;;  %22 = sbr.rel (!%p20_p4) target bundleno = 17 (0x11), region = 131 }
 0x1d2   : > { %s1410_s30 = smov %s1405_s12 }
 0x1d6   :  { %463 = vsyncpa [#allocation7], 1 }
 0x1d7   :  { %465 = vsyncpa [#allocation7 + $0x1], 1 }
 0x1d8   :  { %466 = vsyncpa [#allocation8], 1 }
 0x1d9   :  { %468 = vsyncpa [#allocation8 + $0x1], 1 }
 0x1da   :  { %469 = vsyncmov [#allocation3] }
 0x1dd   :  { %s470_s14 = vpop.sfrf %469 }
 0x1de   :  { %p615_p6 = scmp.ne.s32.totalorder %s470_s14, 0 }
 0x1e0   :  { %474 = shalt.err (%p615_p6)  }
 0x1e1   :  { %476 = vsyncmov [#allocation3 + $0x1] }
 0x1e4   :  { %s477_s24 = vpop.sfrf %476 }
 0x1e5   :  { %p616_p9 = scmp.ne.s32.totalorder %s477_s24, 0 }
 0x1e7   :  { %481 = shalt.err (%p616_p9)  }
 0x1e8   :  { %483 = vsyncmov [#allocation3 + $0x2] }
 0x1eb   :  { %s484_s22 = vpop.sfrf %483 }
 0x1ec   :  { %p617_p10 = scmp.ne.s32.totalorder %s484_s22, 0 }
 0x1ee   :  { %488 = shalt.err (%p617_p10)  }
 0x1ef   :  { %490 = vsyncmov [#allocation3 + $0x3] }
 0x1f2   :  { %s491_s0 = vpop.sfrf %490 }
 0x1f3   :  { %p618_p12 = scmp.ne.s32.totalorder %s491_s0, 0 }
 0x1f5   :  { %495 = shalt.err (%p618_p12)  }
 0x1f6   :  { %497 = vsyncmov [#allocation3 + $0x4] }
 0x1f9   :  { %s498_s1 = vpop.sfrf %497 }
 0x1fa   :  { %p619_p1 = scmp.ne.s32.totalorder %s498_s1, 0 }
 0x1fc   :  { %502 = shalt.err (%p619_p1)  }
 0x1fd   :  { %504 = vsyncmov [#allocation3 + $0x5] }
 0x200   :  { %s505_s3 = vpop.sfrf %504 }
 0x201   :  { %p620_p3 = scmp.ne.s32.totalorder %s505_s3, 0 }
 0x203   :  { %509 = shalt.err (%p620_p3)  }
 0x204   :  { %511 = vsyncmov [#allocation3 + $0x6] }
 0x207   :  { %s512_s4 = vpop.sfrf %511 }
 0x208   :  { %p621_p5 = scmp.ne.s32.totalorder %s512_s4, 0 }
 0x20a   :  { %516 = shalt.err (%p621_p5)  }
 0x20b   :  { %518 = vsyncmov [#allocation3 + $0x7] }
 0x20e   :  { %s519_s5 = vpop.sfrf %518 }
 0x20f   :  { %p622_p8 = scmp.ne.s32.totalorder %s519_s5, 0 }
 0x211   :  { %523 = shalt.err (%p622_p8)  }

</bundles_post_ra>
